<compile_context>
chip_gen: v7x
topology: tpu7x:2x2x1
jax: 0.10.0
libtpu: 0.0.40
codegen_flags: <defaults>
</compile_context>

<pallas_src>
import functools

import jax
import jax.numpy as jnp
import numpy as np
from jax.experimental import pallas as pl
from jax.experimental.pallas import tpu as pltpu


def _round_up(x, m):
    return (x + m - 1) // m * m


def _vmem_capacity_bytes():
    """Physical VMEM per TensorCore; conservative (v7x) fallback if unknown."""
    try:
        info = pltpu.get_tpu_info()
        cap = getattr(info, "vmem_capacity_bytes", None)
        if cap:
            return int(cap)
    except Exception:
        pass
    return 64 * 1024 * 1024


def _channel_attention_kernel(x_ref, w1_ref, w2_ref, o_ref,
                              sum_ref, max_ref, att_ref, *, hw, ragged, mul_f32):
    # x_ref block: (1, C, thw)   -- one spatial tile of one batch element
    # w1_ref: (Cr, C), w2_ref: (C, Cr)   (PyTorch Linear convention [out, in])
    # scratch: sum_ref / max_ref / att_ref are (C, 1) f32, persist across steps
    p = pl.program_id(1)   # phase: 0 = pool/reduce, 1 = attention + multiply
    t = pl.program_id(2)   # spatial tile index
    thw = x_ref.shape[2]

    # ---- phase 0: init accumulators at the first tile of each batch element ----
    @pl.when(jnp.logical_and(p == 0, t == 0))
    def _():
        sum_ref[...] = jnp.zeros_like(sum_ref)
        max_ref[...] = jnp.full_like(max_ref, -jnp.inf)

    def accumulate(mask_lanes):
        xt = x_ref[0].astype(jnp.float32)                      # (C, thw)
        if mask_lanes:  # static: only emitted for the last tile of ragged grids
            col = jax.lax.broadcasted_iota(jnp.int32, xt.shape, 1) + t * thw
            valid = col < hw
            xs = jnp.where(valid, xt, 0.0)                     # OOB lanes -> 0 for sum
            xm = jnp.where(valid, xt, -jnp.inf)                # OOB lanes -> -inf for max
        else:
            xs = xt
            xm = xt
        sum_ref[...] = sum_ref[...] + jnp.sum(xs, axis=-1, keepdims=True)
        max_ref[...] = jnp.maximum(max_ref[...], jnp.max(xm, axis=-1, keepdims=True))

    if ragged:
        # Only the final spatial tile has out-of-bounds (garbage) lanes.
        last = pl.num_programs(2) - 1
        @pl.when(jnp.logical_and(p == 0, t != last))
        def _():
            accumulate(False)

        @pl.when(jnp.logical_and(p == 0, t == last))
        def _():
            accumulate(True)
    else:
        @pl.when(p == 0)
        def _():
            accumulate(False)

    # ---- phase 1, tile 0: fused FC on both pooled branches + sigmoid ----
    @pl.when(jnp.logical_and(p == 1, t == 0))
    def _():
        avg = sum_ref[...] * (1.0 / hw)                        # (C, 1) true mean
        pooled = jnp.concatenate([avg, max_ref[...]], axis=1)  # (C, 2)
        h = jnp.maximum(
            jnp.dot(w1_ref[...], pooled, preferred_element_type=jnp.float32),
            0.0)                                               # (Cr, 2) ReLU
        y = jnp.dot(w2_ref[...], h, preferred_element_type=jnp.float32)  # (C, 2)
        att_ref[...] = jax.nn.sigmoid(y[:, 0:1] + y[:, 1:2])   # (C, 1)

    # ---- phase 1: broadcast-multiply and write this spatial tile ----
    @pl.when(p == 1)
    def _():
        if mul_f32:
            o_ref[0] = (x_ref[0].astype(jnp.float32) * att_ref[...]).astype(o_ref.dtype)
        else:
            # bf16 streaming: multiply in the native dtype (bf16 VALU on v6e/v7x);
            # att is cast once per tile.
            o_ref[0] = x_ref[0] * att_ref[...].astype(o_ref.dtype)


def channel_attention(x, w1, w2, *, tile_cols=None, vmem_limit_bytes=None):
    """x: (B, C, H, W); w1: (C//r, C); w2: (C, C//r).  Returns (B, C, H, W)."""
    B, C, H, W = x.shape
    HW = H * W
    Cr = w1.shape[0]
    itemsize = jnp.dtype(x.dtype).itemsize

    # Generation-aware tile / VMEM budget.
    vmem_capacity = _vmem_capacity_bytes()
    if vmem_capacity >= 96 * 1024 * 1024:            # v5e / v6e: 128 MiB physical
        target_block_bytes = 8 * 1024 * 1024
        vmem_ceiling = 96 * 1024 * 1024
    else:                                            # v7x: 64 MiB physical per TC
        target_block_bytes = 4 * 1024 * 1024
        vmem_ceiling = 44 * 1024 * 1024

    if tile_cols is None:
        tile_cols = (target_block_bytes // max(1, C * itemsize)) // 128 * 128
    tile_cols = max(128, _round_up(int(tile_cols), 128))

    if HW <= tile_cols:
        # Single-pass path: full-extent spatial block, no padding / masking,
        # input block stays resident across both phases (1x read, 1x write).
        thw = HW
        n_t = 1
        ragged = False
    else:
        thw = tile_cols                              # lane-dense multiple of 128
        n_t = pl.cdiv(HW, thw)
        ragged = (HW % thw) != 0                     # partial trailing tile

    # VMEM footprint: double-buffered in + out blocks, weights, scratch.
    block_bytes = C * thw * itemsize
    weight_bytes = 2 * 2 * (Cr * C) * 4
    scratch_bytes = 3 * _round_up(C, 8) * 128 * 4    # (C,1) lane-padded to 128
    footprint = 4 * block_bytes + weight_bytes + scratch_bytes
    if vmem_limit_bytes is None:
        vmem_limit_bytes = int(min(vmem_ceiling,
                                   max(32 * 1024 * 1024, 2 * footprint)))

    mul_f32 = x.dtype != jnp.bfloat16
    kernel = functools.partial(_channel_attention_kernel,
                               hw=HW, ragged=ragged, mul_f32=mul_f32)

    out3 = pl.pallas_call(
        kernel,
        out_shape=jax.ShapeDtypeStruct((B, C, HW), x.dtype),
        grid_spec=pltpu.PrefetchScalarGridSpec(
            num_scalar_prefetch=0,
            grid=(B, 2, n_t),
            in_specs=[
                pl.BlockSpec((1, C, thw), lambda b, p, t: (b, 0, t)),
                pl.BlockSpec((Cr, C), lambda b, p, t: (0, 0)),
                pl.BlockSpec((C, Cr), lambda b, p, t: (0, 0)),
            ],
            # Phase 0: keep the output block parked at tile 0 (never written,
            # never flushed). Phase 1: track the spatial tile -> written once;
            # a partial trailing tile gets a masked store from Pallas.
            out_specs=pl.BlockSpec((1, C, thw), lambda b, p, t: (b, 0, p * t)),
            scratch_shapes=[
                pltpu.VMEM((C, 1), jnp.float32),   # running sum
                pltpu.VMEM((C, 1), jnp.float32),   # running max
                pltpu.VMEM((C, 1), jnp.float32),   # attention weights
            ],
        ),
        compiler_params=pltpu.CompilerParams(
            # phase/tile axes MUST stay "arbitrary": scratch accumulators carry
            # state across them.  Batch is the only parallel (megacore) axis.
            dimension_semantics=("parallel", "arbitrary", "arbitrary"),
            vmem_limit_bytes=vmem_limit_bytes,
        ),
    )(x.reshape(B, C, HW), w1, w2)

    return out3.reshape(B, C, H, W)


def channel_attention_ref(x, w1, w2):
    """Pure-JAX reference matching the PyTorch module semantics."""
    avg = jnp.mean(x, axis=(2, 3))                 # (B, C)
    mx = jnp.max(x, axis=(2, 3))                   # (B, C)

    def fc(v):                                     # v: (B, C)
        h = jnp.maximum(v @ w1.T, 0.0)             # (B, Cr)
        return h @ w2.T                            # (B, C)

    att = jax.nn.sigmoid(fc(avg) + fc(mx))         # (B, C)
    return x * att[:, :, None, None]


if __name__ == "__main__":
    # Small shapes consistent with the module: reduction=16 needs C >= 16.
    B, C, H, W = 2, 32, 16, 16
    reduction = 16
    Cr = C // reduction                            # 2

    key = jax.random.PRNGKey(0)
    kx, k1, k2, kx2, kx3 = jax.random.split(key, 5)

    x = jax.random.normal(kx, (B, C, H, W), dtype=jnp.float32)
    bound1 = 1.0 / np.sqrt(C)
    bound2 = 1.0 / np.sqrt(Cr)
    w1 = jax.random.uniform(k1, (Cr, C), jnp.float32, -bound1, bound1)
    w2 = jax.random.uniform(k2, (C, Cr), jnp.float32, -bound2, bound2)

    ref = channel_attention_ref(x, w1, w2)

    # Path 1: single-pass (HW = 256 fits one full-extent block; 1x read/write).
    out = jax.block_until_ready(channel_attention(x, w1, w2))
    np.testing.assert_allclose(np.asarray(out), np.asarray(ref), rtol=1e-5, atol=1e-5)

    # Path 2: forced multi-tile, non-ragged (256 = 2 x 128 lane-dense tiles).
    out_t = jax.block_until_ready(channel_attention(x, w1, w2, tile_cols=128))
    np.testing.assert_allclose(np.asarray(out_t), np.asarray(ref), rtol=1e-5, atol=1e-5)

    # Path 3: 7x7 (typical CBAM size, HW = 49): full-extent block, no wrapper
    # pad, no in-kernel mask, no output slice.
    x2 = jax.random.normal(kx2, (B, C, 7, 7), dtype=jnp.float32)
    out_p = jax.block_until_ready(channel_attention(x2, w1, w2))
    np.testing.assert_allclose(np.asarray(out_p),
                               np.asarray(channel_attention_ref(x2, w1, w2)),
                               rtol=1e-5, atol=1e-5)

    # Path 4: ragged multi-tile (12x12 = 144 -> 128 + partial 16): in-kernel
    # sum/max masking on the last tile + masked partial output store.
    x3_ = jax.random.normal(kx3, (B, C, 12, 12), dtype=jnp.float32)
    out_pt = jax.block_until_ready(channel_attention(x3_, w1, w2, tile_cols=128))
    np.testing.assert_allclose(np.asarray(out_pt),
                               np.asarray(channel_attention_ref(x3_, w1, w2)),
                               rtol=1e-5, atol=1e-5)

    # Path 5: bf16 streaming mode (half the HBM bytes; f32 accumulators/FC).
    x_bf = x.astype(jnp.bfloat16)
    ref_bf = channel_attention_ref(x_bf.astype(jnp.float32), w1, w2)
    out_bf = jax.block_until_ready(channel_attention(x_bf, w1, w2))
    np.testing.assert_allclose(np.asarray(out_bf).astype(np.float32),
                               np.asarray(ref_bf), rtol=5e-2, atol=5e-2)

    print("KERNEL_OK")
</pallas_src>

<mosaic_0001>
module attributes {stable_mosaic.version = 11 : i64} {
  func.func @_channel_attention_kernel(%arg0: i32, %arg1: i32, %arg2: i32, %arg3: memref<1x32x256xf32, #tpu.memory_space<vmem>>, %arg4: memref<2x32xf32, #tpu.memory_space<vmem>>, %arg5: memref<32x2xf32, #tpu.memory_space<vmem>>, %arg6: memref<1x32x256xf32, #tpu.memory_space<vmem>>, %arg7: memref<32x1xf32, #tpu.memory_space<vmem>>, %arg8: memref<32x1xf32, #tpu.memory_space<vmem>>, %arg9: memref<32x1xf32, #tpu.memory_space<vmem>>) attributes {dimension_semantics = [#tpu.dimension_semantics<parallel>, #tpu.dimension_semantics<arbitrary>, #tpu.dimension_semantics<arbitrary>], iteration_bounds = array<i64: 2, 2, 1>, scalar_prefetch = 0 : i64, scratch_operands = 3 : i64, tpu.core_type = #tpu.core_type<tc>, window_params = [{transform_indices = @transform_0, window_bounds = array<i64: 1, 32, 256>}, {pipeline_mode = #tpu.pipeline_mode<synchronous>, transform_indices = @transform_1, window_bounds = array<i64: 2, 32>}, {pipeline_mode = #tpu.pipeline_mode<synchronous>, transform_indices = @transform_2, window_bounds = array<i64: 32, 2>}, {transform_indices = @transform_3, window_bounds = array<i64: 1, 32, 256>}]} {
    %c0_i32 = arith.constant 0 : i32
    %0 = arith.cmpi eq, %arg1, %c0_i32 : i32
    %c0_i32_0 = arith.constant 0 : i32
    %1 = arith.cmpi eq, %arg2, %c0_i32_0 : i32
    %2 = arith.andi %0, %1 : i1
    %3 = arith.extui %2 : i1 to i32
    %c0_i32_1 = arith.constant 0 : i32
    %4 = arith.cmpi ne, %3, %c0_i32_1 : i32
    scf.if %4 {
      %cst = arith.constant 0.000000e+00 : f32
      %16 = vector.broadcast %cst : f32 to vector<32x1xf32>
      %c0 = arith.constant 0 : index
      %c0_8 = arith.constant 0 : index
      %17 = vector.load %arg7[%c0, %c0_8] : memref<32x1xf32, #tpu.memory_space<vmem>>, vector<32x1xf32>
      tpu.vector_store %arg7[%c0, %c0_8], %16 {strides = array<i32>} : memref<32x1xf32, #tpu.memory_space<vmem>>, vector<32x1xf32>,
      %cst_9 = arith.constant 0xFF800000 : f32
      %18 = vector.broadcast %cst_9 : f32 to vector<32x1xf32>
      %c0_10 = arith.constant 0 : index
      %c0_11 = arith.constant 0 : index
      %19 = vector.load %arg8[%c0_10, %c0_11] : memref<32x1xf32, #tpu.memory_space<vmem>>, vector<32x1xf32>
      tpu.vector_store %arg8[%c0_10, %c0_11], %18 {strides = array<i32>} : memref<32x1xf32, #tpu.memory_space<vmem>>, vector<32x1xf32>,
    } else {
    }
    %c0_i32_2 = arith.constant 0 : i32
    %5 = arith.cmpi eq, %arg1, %c0_i32_2 : i32
    %6 = arith.extui %5 : i1 to i32
    %c0_i32_3 = arith.constant 0 : i32
    %7 = arith.cmpi ne, %6, %c0_i32_3 : i32
    scf.if %7 {
      %c0 = arith.constant 0 : index
      %c0_8 = arith.constant 0 : index
      %c0_9 = arith.constant 0 : index
      %16 = vector.load %arg3[%c0, %c0_8, %c0_9] : memref<1x32x256xf32, #tpu.memory_space<vmem>>, vector<1x32x256xf32>
      %17 = vector.shape_cast %16 : vector<1x32x256xf32> to vector<32x256xf32>
      %c0_10 = arith.constant 0 : index
      %c0_11 = arith.constant 0 : index
      %18 = vector.load %arg7[%c0_10, %c0_11] : memref<32x1xf32, #tpu.memory_space<vmem>>, vector<32x1xf32>
      %cst = arith.constant dense<0.000000e+00> : vector<32xf32>
      %19 = vector.multi_reduction <add>, %17, %cst [1] : vector<32x256xf32> to vector<32xf32>
      %20 = vector.shape_cast %19 : vector<32xf32> to vector<32x1xf32>
      %21 = arith.addf %18, %20 : vector<32x1xf32>
      %c0_12 = arith.constant 0 : index
      %c0_13 = arith.constant 0 : index
      %22 = vector.load %arg7[%c0_12, %c0_13] : memref<32x1xf32, #tpu.memory_space<vmem>>, vector<32x1xf32>
      tpu.vector_store %arg7[%c0_12, %c0_13], %21 {strides = array<i32>} : memref<32x1xf32, #tpu.memory_space<vmem>>, vector<32x1xf32>,
      %c0_14 = arith.constant 0 : index
      %c0_15 = arith.constant 0 : index
      %23 = vector.load %arg8[%c0_14, %c0_15] : memref<32x1xf32, #tpu.memory_space<vmem>>, vector<32x1xf32>
      %cst_16 = arith.constant dense<0xFF800000> : vector<32xf32>
      %24 = vector.multi_reduction <maximumf>, %17, %cst_16 [1] : vector<32x256xf32> to vector<32xf32>
      %25 = vector.shape_cast %24 : vector<32xf32> to vector<32x1xf32>
      %26 = arith.maximumf %23, %25 : vector<32x1xf32>
      %c0_17 = arith.constant 0 : index
      %c0_18 = arith.constant 0 : index
      %27 = vector.load %arg8[%c0_17, %c0_18] : memref<32x1xf32, #tpu.memory_space<vmem>>, vector<32x1xf32>
      tpu.vector_store %arg8[%c0_17, %c0_18], %26 {strides = array<i32>} : memref<32x1xf32, #tpu.memory_space<vmem>>, vector<32x1xf32>,
    } else {
    }
    %c1_i32 = arith.constant 1 : i32
    %8 = arith.cmpi eq, %arg1, %c1_i32 : i32
    %c0_i32_4 = arith.constant 0 : i32
    %9 = arith.cmpi eq, %arg2, %c0_i32_4 : i32
    %10 = arith.andi %8, %9 : i1
    %11 = arith.extui %10 : i1 to i32
    %c0_i32_5 = arith.constant 0 : i32
    %12 = arith.cmpi ne, %11, %c0_i32_5 : i32
    scf.if %12 {
      %c0 = arith.constant 0 : index
      %c0_8 = arith.constant 0 : index
      %16 = vector.load %arg7[%c0, %c0_8] : memref<32x1xf32, #tpu.memory_space<vmem>>, vector<32x1xf32>
      %cst = arith.constant 3.906250e-03 : f32
      %17 = vector.broadcast %cst : f32 to vector<32x1xf32>
      %18 = arith.mulf %16, %17 : vector<32x1xf32>
      %c0_9 = arith.constant 0 : index
      %c0_10 = arith.constant 0 : index
      %19 = vector.load %arg8[%c0_9, %c0_10] : memref<32x1xf32, #tpu.memory_space<vmem>>, vector<32x1xf32>
      %20 = tpu.concatenate %18, %19 in 1 : vector<32x1xf32>, vector<32x1xf32> -> vector<32x2xf32>
      %c0_11 = arith.constant 0 : index
      %c0_12 = arith.constant 0 : index
      %21 = vector.load %arg4[%c0_11, %c0_12] : memref<2x32xf32, #tpu.memory_space<vmem>>, vector<2x32xf32>
      %cst_13 = arith.constant dense<0.000000e+00> : vector<2x2xf32>
      %22 = tpu.matmul %21, %20, %cst_13 {dimension_numbers = #tpu.dot_dimension_numbers<[1], [0], [0], [1], [0, 0, 1, 1], [], []>} : vector<2x32xf32>, vector<32x2xf32>, vector<2x2xf32> -> vector<2x2xf32>
      %cst_14 = arith.constant 0.000000e+00 : f32
      %23 = vector.broadcast %cst_14 : f32 to vector<2x2xf32>
      %24 = arith.maximumf %22, %23 : vector<2x2xf32>
      %c0_15 = arith.constant 0 : index
      %c0_16 = arith.constant 0 : index
      %25 = vector.load %arg5[%c0_15, %c0_16] : memref<32x2xf32, #tpu.memory_space<vmem>>, vector<32x2xf32>
      %cst_17 = arith.constant dense<0.000000e+00> : vector<32x2xf32>
      %26 = tpu.matmul %25, %24, %cst_17 {dimension_numbers = #tpu.dot_dimension_numbers<[1], [0], [0], [1], [0, 0, 1, 1], [], []>} : vector<32x2xf32>, vector<2x2xf32>, vector<32x2xf32> -> vector<32x2xf32>
      %27 = vector.extract_strided_slice %26 {offsets = [0, 0], sizes = [32, 1], strides = [1, 1]} : vector<32x2xf32> to vector<32x1xf32>
      %28 = vector.extract_strided_slice %26 {offsets = [0, 1], sizes = [32, 1], strides = [1, 1]} : vector<32x2xf32> to vector<32x1xf32>
      %29 = arith.addf %27, %28 : vector<32x1xf32>
      %30 = arith.negf %29 : vector<32x1xf32>
      %31 = math.exp %30 : vector<32x1xf32>
      %cst_18 = arith.constant 1.000000e+00 : f32
      %32 = vector.broadcast %cst_18 : f32 to vector<32x1xf32>
      %33 = arith.addf %32, %31 : vector<32x1xf32>
      %34 = arith.divf %32, %33 : vector<32x1xf32>
      %c0_19 = arith.constant 0 : index
      %c0_20 = arith.constant 0 : index
      %35 = vector.load %arg9[%c0_19, %c0_20] : memref<32x1xf32, #tpu.memory_space<vmem>>, vector<32x1xf32>
      tpu.vector_store %arg9[%c0_19, %c0_20], %34 {strides = array<i32>} : memref<32x1xf32, #tpu.memory_space<vmem>>, vector<32x1xf32>,
    } else {
    }
    %c1_i32_6 = arith.constant 1 : i32
    %13 = arith.cmpi eq, %arg1, %c1_i32_6 : i32
    %14 = arith.extui %13 : i1 to i32
    %c0_i32_7 = arith.constant 0 : i32
    %15 = arith.cmpi ne, %14, %c0_i32_7 : i32
    scf.if %15 {
      %c0 = arith.constant 0 : index
      %c0_8 = arith.constant 0 : index
      %c0_9 = arith.constant 0 : index
      %16 = vector.load %arg3[%c0, %c0_8, %c0_9] : memref<1x32x256xf32, #tpu.memory_space<vmem>>, vector<1x32x256xf32>
      %17 = vector.shape_cast %16 : vector<1x32x256xf32> to vector<32x256xf32>
      %c0_10 = arith.constant 0 : index
      %c0_11 = arith.constant 0 : index
      %18 = vector.load %arg9[%c0_10, %c0_11] : memref<32x1xf32, #tpu.memory_space<vmem>>, vector<32x1xf32>
      %19 = vector.broadcast %18 : vector<32x1xf32> to vector<32x256xf32>
      %20 = arith.mulf %17, %19 : vector<32x256xf32>
      %c0_12 = arith.constant 0 : index
      %c0_13 = arith.constant 0 : index
      %c0_14 = arith.constant 0 : index
      %21 = vector.load %arg6[%c0_12, %c0_13, %c0_14] : memref<1x32x256xf32, #tpu.memory_space<vmem>>, vector<1x32x256xf32>
      %22 = vector.shape_cast %21 : vector<1x32x256xf32> to vector<32x256xf32>
      %23 = vector.shape_cast %20 : vector<32x256xf32> to vector<1x32x256xf32>
      tpu.vector_store %arg6[%c0_12, %c0_13, %c0_14], %23 {strides = array<i32>} : memref<1x32x256xf32, #tpu.memory_space<vmem>>, vector<1x32x256xf32>,
    } else {
    }
    return
  }
  func.func @transform_0(%arg0: i32, %arg1: i32, %arg2: i32) -> (i32, i32, i32) {
    %c0_i32 = arith.constant 0 : i32
    %c0_i32_0 = arith.constant 0 : i32
    return %arg0, %c0_i32, %arg2 : i32, i32, i32
  }
  func.func @transform_1(%arg0: i32, %arg1: i32, %arg2: i32) -> (i32, i32) {
    %c0_i32 = arith.constant 0 : i32
    %c0_i32_0 = arith.constant 0 : i32
    %c0_i32_1 = arith.constant 0 : i32
    return %c0_i32, %c0_i32_0 : i32, i32
  }
  func.func @transform_2(%arg0: i32, %arg1: i32, %arg2: i32) -> (i32, i32) {
    %c0_i32 = arith.constant 0 : i32
    %c0_i32_0 = arith.constant 0 : i32
    %c0_i32_1 = arith.constant 0 : i32
    return %c0_i32, %c0_i32_0 : i32, i32
  }
  func.func @transform_3(%arg0: i32, %arg1: i32, %arg2: i32) -> (i32, i32, i32) {
    %0 = arith.muli %arg1, %arg2 : i32
    %c0_i32 = arith.constant 0 : i32
    %c0_i32_0 = arith.constant 0 : i32
    return %arg0, %c0_i32, %0 : i32, i32, i32
  }
}

</mosaic_0001>

<bundles_post_ra>
// kernel: tpu_custom_call.1
= control target key start
LH: loop header
LB: loop body
LE: loop exit
PB: predicated region body
PF: predicated region fallthrough
CT: control target
= control target key end

     0   :  { %8 = vsyncpa [#allocation6], 0  ;;  %s1330_s0 = inlined_call_operand.hbm [shape: f32[2,32,256], index: 0, kind: input, shape index: {}]   ;;  %s1331_s1 = inlined_call_operand.vmem [shape: f32[2,32], index: 1, kind: input, shape index: {}]   ;;  %s1332_s2 = inlined_call_operand.vmem [shape: f32[32,2], index: 2, kind: input, shape index: {}]   ;;  %s1333_s3 = inlined_call_operand.hbm [shape: f32[2,32,256], index: 3, kind: output, shape index: {}]  }
   0x1   :  { %10 = vsyncpa [#allocation6 + $0x1], 0 }
   0x2   :  { %11 = vsyncpa [#allocation7], 0 }
   0x3   :  { %13 = vsyncpa [#allocation7 + $0x1], 0  ;;  %s1073_s12 = smov 0   ;;  %s1075_s13 = smov 0  }
   0x4   :  { %s1077_s14 = smov 0   ;;  %s1079_s15 = smov 0  }
   0x5   :  { %s1081_s16 = smov 0   ;;  %s1083_s17 = smov 0  }
   0x6   :  { %s1085_s18 = smov 0   ;;  %s1087_s19 = smov 0  }
   0x7 LB: > { %s723_s20 = sadd.s32 4294967295, %s1037_s19   ;;  %s724_s21 = sadd.s32 4294967294, %s1037_s19   ;;  %s1037_s19 = sphi %s1087_s19, %s19_s19   ;;  %s1033_s18 = sphi %s1085_s18, %s1349_s18   ;;  %s1029_s17 = sphi %s1083_s17, %s1348_s17   ;;  %s1025_s16 = sphi %s1081_s16, %s1347_s16   ;;  %s1021_s15 = sphi %s1079_s15, %s1346_s15   ;;  %s1017_s14 = sphi %s1077_s14, %s1345_s14   ;;  %s1013_s13 = sphi %s1075_s13, %s1344_s13   ;;  %s1009_s12 = sphi %s1073_s12, %s1343_s12  }
   0x8   : > { %s34_s22 = sadd.s32 1, %s1029_s17  ;;  %s38_s23 = sadd.s32 1, %s1033_s18 }
   0x9   : > { %p36_p0 = scmp.ge.s32.totalorder %s34_s22, 2  ;;  %s47_s24 = sadd.s32 1, %s1017_s14 }
   0xa   : > { %p54_p1 = scmp.ne.s32.totalorder %s1017_s14, %s1013_s13  ;;  %p55_p2 = scmp.eq.s32.totalorder %s1037_s19, 0 }
   0xb   : > { %s1351_s22 = smov (%p36_p0, %s34_s22), 0  ;;  %s1353_s23 = smov (!%p36_p0, %s38_s23), %s1033_s18 }
   0xc   : > { %p1124_p3 = por %p55_p2, %p54_p1  ;;  %p60_p4 = scmp.ne.s32.totalorder %s1013_s13, %s1009_s12 }
   0xd   : > { %p40_p5 = scmp.ge.s32.totalorder %s1353_s23, 2  ;;  %p61_p6 = scmp.eq.s32.totalorder %s723_s20, 0 }
   0xe   : > { %p130_p7 = scmp.eq.s32.totalorder %s723_s20, 3  ;;  %p136_p8 = scmp.eq.s32.totalorder %s724_s21, 3 }
   0xf   : > { %s1355_s23 = smov (%p40_p5, %s1353_s23), 0  ;;  %p1132_p9 = por %p61_p6, %p60_p4 }
  0x10   : > { %p1136_p10 = por %p130_p7, %p54_p1  ;;  %s42_s28 = ssub.s32 %s1033_s18, %s1355_s23 }
  0x11   : > { %p1142_p11 = por %p136_p8, %p60_p4  ;;  %p45_p12 = scmp.eq.s32.totalorder %s42_s28, 0 }
  0x12   : > { %s1337_s27 = scalar_select %p1136_p10, 1, 0 }
  0x13   : > { %s1338_s29 = scalar_select %p1142_p11, 1, 0 }
  0x14   : > { %p803_p13 = scmp.lt.s32.totalorder %s1037_s19, 4  ;;  %s162_s30 = sand.u32 1, %s1017_s14  }
  0x15   : > { %s1149_s4 = scalar_select %p45_p12, %s1017_s14, %s47_s24  }
  0x16   : > { %s727_s5 = sshll.u32 %s162_s30, 6  ;;  %s752_s6 = sshll.u32 %s1033_s18, 10 }
  0x17   : > { %s1155_s9 = scalar_lea.hbm %s1330_s0, %s752_s6  ;;  %s166_s10 = scalar_lea.vmem [#allocation5], %s727_s5 }
  0x18   : > { %s175_s11 = sshll.u32 %s166_s10, 4  ;;  %p1161_p0 = pnand %p803_p13, %p1124_p3  ;;  %s1157_s11 = int_to_ptr.vmem [resolvable:$true] %s175_s11 }
  0x19   : > { %s1166_s21 = scalar_lea.sflag [#allocation6], %s162_s30  ;;  %s909_s24 = scalar_lea.hbm %s1155_s9, 1024 }
  0x1a   : > { %p910_p2 = scmp.ne.s32.totalorder %s1155_s9, %s909_s24  ;;  %p911_p4 = pneg %p1161_p0 }
  0x1b   : > { %s914_s25 = scalar_lea.hbm %s1330_s0, 2048  ;;  %p915_p3 = scmp.lt.u32.totalorder %s1155_s9, %s1330_s0 }
  0x1c   : > { %p912_p5 = pnand %p911_p4, %p910_p2  ;;  %p916_p7 = scmp.lt.u32.totalorder %s914_s25, %s909_s24 }
  0x1d   : > { %p918_p12 = scmp.lt.u32.totalorder %s909_s24, %s1155_s9 }
  0x1e   : > { %p913_p6 = pneg %p912_p5  ;;  %p917_p8 = por %p916_p7, %p915_p3 }
  0x20   : > { %p919_p13 = por %p918_p12, %p917_p8 }
  0x22   : > { %p920_p1 = pnand %p919_p13, %p913_p6 }
  0x24   : > { %923 = shalt.err (!%p920_p1)
}
  0x25   : > { %s924_s30 = scalar_lea.vmem %s1157_s11, 1024  ;;  %s1039_s8 = smov [#allocation5]  }
  0x26   : > { %p925_p2 = scmp.ne.s32.totalorder %s1157_s11, %s924_s30  ;;  %s929_s10 = sshll.u32 %s1039_s8, 4  ;;  %s930_s10 = int_to_ptr.vmem [resolvable:$false] %s929_s10 }
  0x27   : > { %s931_s28 = scalar_lea.vmem %s930_s10, 2048  ;;  %p932_p10 = scmp.lt.s32.totalorder %s1157_s11, %s930_s10 }
  0x28   : > { %p927_p5 = pnand %p925_p2, %p911_p4  ;;  %p933_p3 = scmp.lt.s32.totalorder %s931_s28, %s924_s30 }
  0x2a   : > { %p928_p11 = pneg %p927_p5  ;;  %p934_p7 = por %p933_p3, %p932_p10 }
  0x2c   : > { %p935_p8 = pnand %p934_p7, %p928_p11 }
  0x2e   : > { %938 = shalt.err (!%p935_p8)
}
  0x2f   : > { %s1040_s24 = smov 256   ;;  %s1041_s5 = smov 16  }
  0x30   : > { %798 = dma.hbm_to_vmem [thread:$0]  (!%p1161_p0), %s1155_s9, 1024, %s1157_s11, %s1166_s21, %s1040_s24, %s1040_s24, %s1041_s5  }
  0x31   : > { %p183_p1 = scmp.lt.s32.totalorder %s1037_s19, 5  ;;  %p1340_p4 = scmp.ge.s32.totalorder %s1037_s19, 1 }
  0x33   : > { %p184_p6 = pnand %p1340_p4, %p183_p1 }
  0x34   : > { %s1198_s25 = sand.u32 (!%p184_p6), 1, %s1013_s13  }
  0x35   : > { %187 = sbr.rel (%p184_p6) target bundleno = 1109 (0x455), region = 32  ;;  %s731_s6 = sshll.u32 (!%p184_p6), %s1198_s25, 6 }
  0x36   : > { %s190_s7 = scalar_lea.sflag (!%p184_p6), [#allocation6], %s1198_s25  ;;  %s1202_s30 = scalar_lea.vmem (!%p184_p6), [#allocation5], %s731_s6 }
  0x3c   : > { %1000 = dma.done.wait (%p1132_p9), %s190_s7, 1024  }
  0x3d   : > { %1002 = vsyncadd (%p1132_p9), %s190_s7, 4294966272  ;;  %p219_p10 = scmp.eq.s32.totalorder %s1021_s15, 0  ;;  %s1209_s9 = scalar_lea.vmem [#allocation8], %s731_s6 }
  0x3e   : > { %vm225_vm0 = vcmask (%p219_p10), 7168   ;;  %v1042_v0 = vmov (%p219_p10), 0.0   ;;  %v1043_v1 = vmov (%p219_p10), -inf  }
  0x3f   : > { %224 = sbr.rel (!%p219_p10) target bundleno = 70 (0x46), region = 40  ;;  %226 = vst.msk [vmem:[#allocation2] sm:$0xff] (%p219_p10), %vm225_vm0, %v1042_v0  ;;  %227 = vst.msk [vmem:[#allocation2 + $0x8] sm:$0xff] (%p219_p10), %vm225_vm0, %v1042_v0 }
  0x40   : > { %228 = vst.msk [vmem:[#allocation2 + $0x10] sm:$0xff] (%p219_p10), %vm225_vm0, %v1042_v0  ;;  %229 = vst.msk [vmem:[#allocation2 + $0x18] sm:$0xff] (%p219_p10), %vm225_vm0, %v1042_v0 }
  0x41   : > { %230 = vst.msk [vmem:[#allocation3] sm:$0xff] (%p219_p10), %vm225_vm0, %v1043_v1  ;;  %231 = vst.msk [vmem:[#allocation3 + $0x8] sm:$0xff] (%p219_p10), %vm225_vm0, %v1043_v1 }
  0x42   : > { %232 = vst.msk [vmem:[#allocation3 + $0x10] sm:$0xff] (%p219_p10), %vm225_vm0, %v1043_v1  ;;  %233 = vst.msk [vmem:[#allocation3 + $0x18] sm:$0xff] (%p219_p10), %vm225_vm0, %v1043_v1 }
  0x46 PF: > { %p734_p11 = scmp.ne.s32.totalorder %s1021_s15, 0 }
  0x47   : > { %v241_v2 = vld [vmem:[%s1202_s30 + $0x20] sm:$0xff] (!%p734_p11)  ;;  %v242_v3 = vld [vmem:[%s1202_s30 + $0x28] sm:$0xff] (!%p734_p11)  ;;  %v243_v7 = vld [vmem:[%s1202_s30 + $0x30] sm:$0xff] (!%p734_p11)  ;;  %vm265_vm1 = vcmask (!%p734_p11), 7168  }
  0x48   : > { %236 = sbr.rel (%p734_p11) target bundleno = 232 (0xe8), region = 44  ;;  %v237_v4 = vld [vmem:[%s1202_s30] sm:$0xff] (!%p734_p11)  ;;  %v255_v5 = vadd.f32 (!%p734_p11), %v242_v3, %v241_v2  ;;  %v238_v6 = vld [vmem:[%s1202_s30 + $0x8] sm:$0xff] (!%p734_p11)  ;;  %v244_v8 = vld [vmem:[%s1202_s30 + $0x38] sm:$0xff] (!%p734_p11)  ;;  %v280_v17 = vmax.f32 (!%p734_p11), %v241_v2, %v242_v3 }
  0x49   : > { %v249_v9 = vadd.f32 (!%p734_p11), %v238_v6, %v237_v4  ;;  %v239_v10 = vld [vmem:[%s1202_s30 + $0x10] sm:$0xff] (!%p734_p11)  ;;  %v240_v11 = vld [vmem:[%s1202_s30 + $0x18] sm:$0xff] (!%p734_p11)  ;;  %v258_v12 = vadd.f32 (!%p734_p11), %v244_v8, %v243_v7  ;;  %v274_v15 = vmax.f32 (!%p734_p11), %v237_v4, %v238_v6  ;;  %v283_v16 = vmax.f32 (!%p734_p11), %v243_v7, %v244_v8  ;;  %v245_v19 = vld [vmem:[#allocation2] sm:$0xff] (!%p734_p11) }
  0x4a   : > { %256 = vadd.xlane.f32.xlu1 (!%p734_p11), %v255_v5  ;;  %v252_v13 = vadd.f32 (!%p734_p11), %v240_v11, %v239_v10  ;;  %v277_v14 = vmax.f32 (!%p734_p11), %v239_v10, %v240_v11  ;;  %v247_v18 = vld [vmem:[#allocation2 + $0x10] sm:$0xff] (!%p734_p11)  ;;  %v248_v24 = vld [vmem:[#allocation2 + $0x18] sm:$0xff] (!%p734_p11)  ;;  %v246_v25 = vld [vmem:[#allocation2 + $0x8] sm:$0xff] (!%p734_p11) }
  0x4b   : > { %250 = vadd.xlane.f32.xlu0 (!%p734_p11), %v249_v9  ;;  %v271_v30 = vld [vmem:[#allocation3 + $0x8] sm:$0xff] (!%p734_p11)  ;;  %v270_v31 = vld [vmem:[#allocation3] sm:$0xff] (!%p734_p11)  ;;  %v273_v36 = vld [vmem:[#allocation3 + $0x18] sm:$0xff] (!%p734_p11) }
  0x4c   : > { %v272_v37 = vld [vmem:[#allocation3 + $0x10] sm:$0xff] (!%p734_p11) }
  0x4e   : > { %259 = vadd.xlane.f32.xlu1 (!%p734_p11), %v258_v12 }
  0x4f   : > { %253 = vadd.xlane.f32.xlu0 %v252_v13 }
  0x52   : > { %278 = vmax.xlane.f32.xlu1 %v277_v14 }
  0x53   : > { %275 = vmax.xlane.f32.xlu0 %v274_v15 }
  0x56   : > { %284 = vmax.xlane.f32.xlu1 %v283_v16 }
  0x57   : > { %281 = vmax.xlane.f32.xlu0 %v280_v17 }
  0xd7   : > { %v257_v20 = vpop.xlane.xlu1 %256 }
  0xd8   : > { %v263_v21 = vadd.f32 %v257_v20, %v247_v18  ;;  %v251_v22 = vpop.xlane.xlu0 %250 }
  0xd9   : > { %v261_v23 = vadd.f32 %v251_v22, %v245_v19 }
  0xda   : > { %268 = vst.msk [vmem:[#allocation2 + $0x10] sm:$0xff] %vm265_vm1, %v263_v21 }
  0xdb   : > { %266 = vst.msk [vmem:[#allocation2] sm:$0xff] %vm265_vm1, %v261_v23  ;;  %v260_v26 = vpop.xlane.xlu1 %259 }
  0xdc   : > { %v264_v27 = vadd.f32 %v260_v26, %v248_v24  ;;  %v254_v28 = vpop.xlane.xlu0 %253 }
  0xdd   : > { %v262_v29 = vadd.f32 %v254_v28, %v246_v25 }
  0xde   : > { %269 = vst.msk [vmem:[#allocation2 + $0x18] sm:$0xff] %vm265_vm1, %v264_v27 }
  0xdf   : > { %267 = vst.msk [vmem:[#allocation2 + $0x8] sm:$0xff] %vm265_vm1, %v262_v29  ;;  %v279_v32 = vpop.xlane.xlu1 %278 }
  0xe0   : > { %v287_v33 = vmax.f32 %v271_v30, %v279_v32  ;;  %v276_v34 = vpop.xlane.xlu0 %275 }
  0xe1   : > { %v286_v35 = vmax.f32 %v270_v31, %v276_v34 }
  0xe2   : > { %291 = vst.msk [vmem:[#allocation3 + $0x8] sm:$0xff] %vm265_vm1, %v287_v33 }
  0xe3   : > { %290 = vst.msk [vmem:[#allocation3] sm:$0xff] %vm265_vm1, %v286_v35  ;;  %v285_v38 = vpop.xlane.xlu1 %284 }
  0xe4   : > { %v289_v39 = vmax.f32 %v273_v36, %v285_v38  ;;  %v282_v40 = vpop.xlane.xlu0 %281 }
  0xe5   : > { %v288_v41 = vmax.f32 %v272_v37, %v282_v40 }
  0xe6   : > { %293 = vst.msk [vmem:[#allocation3 + $0x18] sm:$0xff] %vm265_vm1, %v289_v39 }
  0xe7   : > { %292 = vst.msk [vmem:[#allocation3 + $0x10] sm:$0xff] %vm265_vm1, %v288_v41 }
  0xe8 PF: > { %p294_p9 = scmp.eq.s32.totalorder %s1021_s15, 1 }
  0xe9   : > { %v308_v43 = vld [vmem:[#allocation3 + $0x8] sm:$0xff] (%p294_p9)  ;;  %v1044_v47 = vmov (%p294_p9), 0.0|0.0   ;;  %vm1045_vm2 = vmmov (%p294_p9), 0   ;;  %v1046_v48 = vmov (%p294_p9), 0.0   ;;  %s1047_s26 = smov (%p294_p9), 1   ;;  %v299_v50 = vld [vmem:[#allocation2] sm:$0xff] (%p294_p9) }
  0xea   : > { %298 = sbr.rel (!%p294_p9) target bundleno = 944 (0x3b0), region = 48  ;;  %v307_v42 = vld [vmem:[#allocation3] sm:$0xff] (%p294_p9)  ;;  %785 = vmatprep.subr.bf16.mxu0 (%p294_p9), %v1044_v47  ;;  %774 = vmatprep.mubr.msk.f32.mxu0 (%p294_p9), %vm1045_vm2, %v1046_v48  ;;  %v300_v51 = vld [vmem:[#allocation2 + $0x8] sm:$0xff] (%p294_p9)  ;;  %v303_v52 = vmul.f32 (%p294_p9), 0.00390625, %v299_v50  ;;  %vm327_vm3 = vcmask (%p294_p9), 7168   ;;  %v301_v55 = vld [vmem:[#allocation2 + $0x10] sm:$0xff] (%p294_p9) }
  0xeb   : > { %v881_v45 = vpack.i.bf16 (%p294_p9), %v308_v43, %v307_v42  ;;  %v304_v53 = vmul.f32 (%p294_p9), 0.00390625, %v300_v51  ;;  %v302_v56 = vld [vmem:[#allocation2 + $0x18] sm:$0xff] (%p294_p9)  ;;  %v305_v61 = vmul.f32 (%p294_p9), 0.00390625, %v301_v55  ;;  %v332_v6 = vld [vmem:[%s1331_s1] sm:$0x3] (%p294_p9)  ;;  %vm333_vm4 = vcmask (%p294_p9), 261120  }
  0xec   : > { %v306_v62 = vmul.f32 (%p294_p9), 0.00390625, %v302_v56  ;;  %v408_v7 = vld [vmem:[%s1332_s2] sm:$0xff] (%p294_p9)  ;;  %vm412_vm5 = vcmask (%p294_p9), 15360   ;;  %vm425_vm6 = vcmask (%p294_p9), 1041408   ;;  %v409_v11 = vld [vmem:[%s1332_s2 + $0x8] sm:$0xff] (%p294_p9)  ;;  %v410_v12 = vld [vmem:[%s1332_s2 + $0x10] sm:$0xff] (%p294_p9) }
  0xed   : > { %v310_v46 = vld [vmem:[#allocation3 + $0x18] sm:$0xff] (%p294_p9)  ;;  %882 = vrot.lane.b32.xlu0 (%p294_p9), %v881_v45, %s1047_s26  ;;  %779 = vmatprep.mubr.msk.f32.mxu1 (%p294_p9), %vm412_vm5, %v408_v7 }
  0xee   : > { %v309_v44 = vld [vmem:[#allocation3 + $0x10] sm:$0xff] (%p294_p9)  ;;  %v411_v13 = vld [vmem:[%s1332_s2 + $0x18] sm:$0xff] (%p294_p9) }
  0xef   : > { %v886_v49 = vpack.i.bf16 (%p294_p9), %v310_v46, %v309_v44 }
  0xf1   : > { %887 = vrot.lane.b32.xlu0 %v886_v49, %s1047_s26  ;;  %s1048_s26 = smov 127  }
 0x15f   : > { %v883_v54 = vpop.permute.xlu0 %882 }
 0x160   : > { %v885_v57 = vunpack.i.h.bf16 %v883_v54  ;;  %v884_v58 = vunpack.i.l.bf16 %v883_v54 }
 0x162   : > { %v328_v59 = vsel %vm327_vm3, %v303_v52, %v884_v58  ;;  %v329_v60 = vsel %vm327_vm3, %v304_v53, %v885_v57 }
 0x163   : > { %v888_v63 = vpop.permute.xlu0 %887  ;;  %v786_v0 = vpack.c.bf16 %v329_v60, %v328_v59 }
 0x164   : > { %v890_v1 = vunpack.i.h.bf16 %v888_v63  ;;  %v889_v2 = vunpack.i.l.bf16 %v888_v63 }
 0x165   : > { %787 = vmatpush3.bf16.msra.mxu0 %v786_v0 }
 0x166   : > { %788 = vmatprep.subr.bf16.mxu0 %v1044_v47  ;;  %v330_v3 = vsel %vm327_vm3, %v305_v61, %v889_v2  ;;  %v331_v4 = vsel %vm327_vm3, %v306_v62, %v890_v1 }
 0x167   : > { %v789_v5 = vpack.c.bf16 %v331_v4, %v330_v3 }
 0x169   : > { %790 = vmatpush3.bf16.msra.mxu0 %v789_v5 }
 0x16c   : > { %775 = vmatmul.mubr.msk.f32.vlgmr.msra.gmra.mrb[0].mxu0 %vm333_vm4, %v332_v6 }
 0x23f   : > { %v403_v8 = vpop.f32.mrb[0].mxu0 }
 0x240   : > { %v407_v9 = vmax.f32 %v403_v8, 0.0  ;;  %v776_v10 = vpop.f32.mrb[1].mxu0 }
 0x242   : > { %777 = vmatprep.subr.msk.mxu1 %vm425_vm6, %v407_v9 }
 0x243   : > { %778 = vmatpush3.msk.msra.mxu1 %vm425_vm6, %v407_v9 }
 0x244   : > { %780 = vmatmul.mubr.msk.f32.vlgmr.msra.gmra.mrb[0].mxu1 %vm412_vm5, %v409_v11 }
 0x245   : > { %782 = vmatprep.mubr.msk.f32.mxu1 %vm412_vm5, %v410_v12 }
 0x248   : > { %783 = vmatmul.mubr.msk.f32.gmra.mrb[2].mxu1 %vm412_vm5, %v411_v13 }
 0x317   : > { %v781_v14 = vpop.f32.mrb[0].mxu1 }
 0x318   : > { %520 = vrot.lane.b32.xlu1 %v781_v14, %s1048_s26  ;;  %v495_v15 = vpop.f32.mrb[1].mxu1 }
 0x31b   : > { %v784_v16 = vpop.f32.mrb[2].mxu1 }
 0x31c   : > { %518 = vrot.lane.b32.xlu1 %v495_v15, %s1048_s26  ;;  %v505_v17 = vpop.f32.mrb[3].mxu1 }
 0x31d   : > { %522 = vrot.lane.b32.xlu0 %v505_v17, %s1048_s26 }
 0x320   : > { %524 = vrot.lane.b32.xlu1 %v784_v16, %s1048_s26 }
 0x38a   : > { %v521_v18 = vpop.permute.xlu1 %520 }
 0x38b   : > { %v531_v19 = vadd.f32 %v781_v14, %v521_v18 }
 0x38d   : > { %v743_v20 = vmul.f32 -1.442695, %v531_v19 }
 0x38e   : > { %v519_v21 = vpop.permute.xlu1 %518 }
 0x38f   : > { %891 = vpow2.f32 %v743_v20  ;;  %v530_v22 = vadd.f32 %v519_v21, %v495_v15  ;;  %v523_v23 = vpop.permute.xlu0 %522 }
 0x390   : > { %v532_v24 = vadd.f32 %v523_v23, %v505_v17 }
 0x391   : > { %v742_v25 = vmul.f32 -1.442695, %v530_v22 }
 0x392   : > { %v744_v26 = vmul.f32 -1.442695, %v532_v24  ;;  %v525_v27 = vpop.permute.xlu1 %524 }
 0x393   : > { %893 = vpow2.f32 %v742_v25  ;;  %v533_v28 = vadd.f32 %v784_v16, %v525_v27 }
 0x394   : > { %895 = vpow2.f32 %v744_v26 }
 0x395   : > { %v745_v29 = vmul.f32 -1.442695, %v533_v28 }
 0x397   : > { %897 = vpow2.f32 %v745_v29 }
 0x399   : > { %v892_v30 = vpop.eup %891 }
 0x39a   : > { %v547_v31 = vadd.f32 1.0, %v892_v30 }
 0x39c   : > { %899 = vrcp.f32 %v547_v31 }
 0x39d   : > { %v894_v32 = vpop.eup %893 }
 0x39e   : > { %v896_v33 = vpop.eup %895  ;;  %v546_v34 = vadd.f32 1.0, %v894_v32 }
 0x39f   : > { %v548_v35 = vadd.f32 1.0, %v896_v33 }
 0x3a0   : > { %901 = vrcp.f32 %v546_v34 }
 0x3a1   : > { %v898_v36 = vpop.eup %897  ;;  %903 = vrcp.f32 %v548_v35 }
 0x3a2   : > { %v549_v37 = vadd.f32 1.0, %v898_v36 }
 0x3a4   : > { %905 = vrcp.f32 %v549_v37 }
 0x3a6   : > { %v900_v38 = vpop.eup %899 }
 0x3a7   : > { %559 = vst.msk [vmem:[#allocation4 + $0x8] sm:$0xff] %vm327_vm3, %v900_v38 }
 0x3aa   : > { %v902_v39 = vpop.eup %901 }
 0x3ab   : > { %v904_v40 = vpop.eup %903  ;;  %558 = vst.msk [vmem:[#allocation4] sm:$0xff] %vm327_vm3, %v902_v39 }
 0x3ac   : > { %560 = vst.msk [vmem:[#allocation4 + $0x10] sm:$0xff] %vm327_vm3, %v904_v40 }
 0x3ae   : > { %v906_v41 = vpop.eup %905 }
 0x3af   : > { %561 = vst.msk [vmem:[#allocation4 + $0x18] sm:$0xff] %vm327_vm3, %v906_v41 }
 0x3b0 PF: > { %p746_p0 = scmp.ne.s32.totalorder %s1021_s15, 1 }
 0x3b1   : > { %v1049_v44 = vmov (!%p746_p0), 0   ;;  %v574_v46 = vld [vmem:[#allocation4 + $0x8] sm:$0xff] (!%p746_p0)  ;;  %v569_v47 = vld [vmem:[%s1202_s30 + $0x20] sm:$0xff] (!%p746_p0)  ;;  %v571_v57 = vld [vmem:[%s1202_s30 + $0x30] sm:$0xff] (!%p746_p0) }
 0x3b2   : > { %564 = sbr.rel (%p746_p0) target bundleno = 1083 (0x43b), region = 52  ;;  %v573_v43 = vld [vmem:[#allocation4] sm:$0xff] (!%p746_p0)  ;;  %908 = vset.pattern.permute.xlu1 (!%p746_p0), %v1049_v44  ;;  %907 = vset.pattern.permute.xlu0 (!%p746_p0), %v1049_v44  ;;  %v570_v48 = vld [vmem:[%s1202_s30 + $0x28] sm:$0xff] (!%p746_p0)  ;;  %v572_v58 = vld [vmem:[%s1202_s30 + $0x38] sm:$0xff] (!%p746_p0) }
 0x3b3   : > { %v575_v42 = vld [vmem:[#allocation4 + $0x10] sm:$0xff] (!%p746_p0)  ;;  %579 = vperm.xlu0 (!%p746_p0), %907, %v573_v43   ;;  %v565_v49 = vld [vmem:[%s1202_s30] sm:$0xff] (!%p746_p0)  ;;  %v566_v50 = vld [vmem:[%s1202_s30 + $0x8] sm:$0xff] (!%p746_p0) }
 0x3b4   : > { %589 = vperm.xlu1 (!%p746_p0), %908, %v575_v42   ;;  %v567_v59 = vld [vmem:[%s1202_s30 + $0x10] sm:$0xff] (!%p746_p0)  ;;  %v568_v60 = vld [vmem:[%s1202_s30 + $0x18] sm:$0xff] (!%p746_p0) }
 0x3b6   : > { %v576_v45 = vld [vmem:[#allocation4 + $0x18] sm:$0xff] (!%p746_p0) }
 0x3b7   : > { %584 = vperm.xlu0 (!%p746_p0), %907, %v574_v46  }
 0x3b8   : > { %594 = vperm.xlu1 (!%p746_p0), %908, %v576_v45  }
 0x432   : > { %v580_v52 = vpop.permute.xlu0 %579 }
 0x433   : > { %v590_v51 = vpop.permute.xlu1 %589  ;;  %v597_v55 = vmul.f32 %v580_v52, %v565_v49  ;;  %v598_v56 = vmul.f32 %v580_v52, %v566_v50 }
 0x434   : > { %v601_v53 = vmul.f32 %v590_v51, %v569_v47  ;;  %v602_v54 = vmul.f32 %v590_v51, %v570_v48 }
 0x435   : > { %605 = vst [vmem:[%s1209_s9] sm:$0xff] %v597_v55  ;;  %606 = vst [vmem:[%s1209_s9 + $0x8] sm:$0xff] %v598_v56 }
 0x436   : > { %609 = vst [vmem:[%s1209_s9 + $0x20] sm:$0xff] %v601_v53  ;;  %610 = vst [vmem:[%s1209_s9 + $0x28] sm:$0xff] %v602_v54  ;;  %v585_v62 = vpop.permute.xlu0 %584 }
 0x437   : > { %v595_v61 = vpop.permute.xlu1 %594  ;;  %v599_v1 = vmul.f32 %v585_v62, %v567_v59  ;;  %v600_v2 = vmul.f32 %v585_v62, %v568_v60 }
 0x438   : > { %v603_v63 = vmul.f32 %v595_v61, %v571_v57  ;;  %v604_v0 = vmul.f32 %v595_v61, %v572_v58 }
 0x439   : > { %607 = vst [vmem:[%s1209_s9 + $0x10] sm:$0xff] %v599_v1  ;;  %608 = vst [vmem:[%s1209_s9 + $0x18] sm:$0xff] %v600_v2 }
 0x43a   : > { %611 = vst [vmem:[%s1209_s9 + $0x30] sm:$0xff] %v603_v63  ;;  %612 = vst [vmem:[%s1209_s9 + $0x38] sm:$0xff] %v604_v0 }
 0x43b PF: > { %s755_s15 = sshll.u32 %s1025_s16, 10  ;;  %s630_s21 = sshll.u32 %s1209_s9, 4  ;;  %s1276_s21 = int_to_ptr.vmem [resolvable:$true] %s630_s21 }
 0x43c   : > { %s1273_s20 = scalar_lea.hbm %s1333_s3, %s755_s15  ;;  %s614_s8 = scalar_lea.sflag [#allocation7], %s1198_s25 }
 0x43d   : > { %s939_s10 = scalar_lea.vmem %s1276_s21, 1024  ;;  %p1341_p13 = scmp.ne.s32.totalorder %s1337_s27, 0 }
 0x43e   : > { %p940_p12 = scmp.ne.s32.totalorder %s1276_s21, %s939_s10  ;;  %s1050_s28 = smov [#allocation8]  }
 0x43f   : > { %s943_s24 = sshll.u32 %s1050_s28, 4  ;;  %s944_s24 = int_to_ptr.vmem [resolvable:$false] %s943_s24 }
 0x440   : > { %p941_p2 = pnand %p940_p12, %p1341_p13  ;;  %s945_s16 = scalar_lea.vmem %s944_s24, 2048 }
 0x441   : > { %p946_p3 = scmp.lt.s32.totalorder %s1276_s21, %s944_s24  ;;  %p947_p7 = scmp.lt.s32.totalorder %s945_s16, %s939_s10 }
 0x442   : > { %p942_p5 = pneg %p941_p2 }
 0x443   : > { %p948_p8 = por %p947_p7, %p946_p3 }
 0x445   : > { %p949_p1 = pnand %p948_p8, %p942_p5 }
 0x447   : > { %952 = shalt.err (!%p949_p1)
}
 0x448   : > { %s953_s9 = scalar_lea.hbm %s1273_s20, 1024  ;;  %s957_s7 = scalar_lea.hbm %s1333_s3, 2048 }
 0x449   : > { %p954_p4 = scmp.ne.s32.totalorder %s1273_s20, %s953_s9  ;;  %p958_p11 = scmp.lt.u32.totalorder %s1273_s20, %s1333_s3 }
 0x44a   : > { %p959_p9 = scmp.lt.u32.totalorder %s957_s7, %s953_s9  ;;  %p961_p12 = scmp.lt.u32.totalorder %s953_s9, %s1273_s20 }
 0x44b   : > { %p955_p6 = pnand %p954_p4, %p1341_p13 }
 0x44c   : > { %p960_p0 = por %p959_p9, %p958_p11 }
 0x44d   : > { %p956_p10 = pneg %p955_p6 }
 0x44e   : > { %p962_p2 = por %p961_p12, %p960_p0 }
 0x450   : > { %p963_p5 = pnand %p962_p2, %p956_p10 }
 0x452   : > { %966 = shalt.err (!%p963_p5)
}
 0x453   : > { %s1051_s30 = smov 256   ;;  %s1052_s11 = smov 16  }
 0x454   : > { %793 = dma.vmem_to_hbm [thread:$0]  (%p1341_p13), %s1276_s21, 1024, %s1273_s20, %s614_s8, %s1051_s30, %s1051_s30, %s1052_s11  }
 0x455 PF: > { %p804_p3 = scmp.ge.s32.totalorder %s1037_s19, 2  ;;  %s645_s10 = sand.u32 1, %s1009_s12  }
 0x456   : > { %p1342_p7 = scmp.ne.s32.totalorder %s1338_s29, 0  ;;  %s646_s28 = scalar_lea.sflag [#allocation7], %s645_s10 }
 0x458   : > { %p800_p8 = pnand %p804_p3, %p1342_p7 }
 0x45a   : > { %1004 = dma.done.wait (!%p800_p8), %s646_s28, 1024  }
 0x45b   : > { %1006 = vsyncadd (!%p800_p8), %s646_s28, 4294966272  ;;  %s19_s19 = sadd.s32 1, %s1037_s19   ;;  %s1343_s12 = smov %s1013_s13 }
 0x45c   : > { %p16_p1 = scmp.ge.s32.totalorder %s19_s19, 6   ;;  %s1344_s13 = smov %s1017_s14 }
 0x45d   : > { %s1345_s14 = smov %s1149_s4  ;;  %s1346_s15 = smov %s1029_s17 }
 0x45e   : > { %s1347_s16 = smov %s1033_s18  ;;  %s1348_s17 = smov %s1351_s22 }
 0x45f   : > { %s1349_s18 = smov %s1355_s23  ;;  %18 = sbr.rel (!%p16_p1) target bundleno = 7 (0x7), region = 93 }
 0x466   :  { %651 = vsyncpa [#allocation6], 1 }
 0x467   :  { %653 = vsyncpa [#allocation6 + $0x1], 1 }
 0x468   :  { %654 = vsyncpa [#allocation7], 1 }
 0x469   :  { %656 = vsyncpa [#allocation7 + $0x1], 1 }

</bundles_post_ra>
